<compile_context>
chip_gen: v7x
topology: tpu7x:2x2x1
jax: 0.10.0
libtpu: 0.0.40
codegen_flags: <defaults>
</compile_context>

<pallas_src>
import functools

import jax
import jax.numpy as jnp
from jax.experimental import pallas as pl
from jax.experimental.pallas import tpu as pltpu

IN_FEATURES = 20
HIDDEN = 256
OUT_FEATURES = 10
OUT_PAD = 128          # lane-dense output width (cols 10..127 are zeros)
DEFAULT_TB = 1024      # batch tile; multiple of 8, ~2 MB VMEM footprint


def _round_up(x, m):
    return ((x + m - 1) // m) * m


def mlp_kernel(x_ref, w1_ref, b1_ref, w2_ref, b2_ref, o_ref):
    # First linear layer: (TB, 20)bf16 @ (20, 256)bf16 -> f32, + bias, ReLU.
    h = jnp.dot(x_ref[...], w1_ref[...], preferred_element_type=jnp.float32)
    h = jnp.maximum(h + b1_ref[...], 0.0)
    # Second linear layer: (TB, 256)bf16 @ (256, 128)bf16 -> f32, + bias.
    out = jnp.dot(h.astype(jnp.bfloat16), w2_ref[...],
                  preferred_element_type=jnp.float32)
    o_ref[...] = (out + b2_ref[...]).astype(o_ref.dtype)


@functools.partial(jax.jit, static_argnames=("tb",))
def mlp_forward(x, w1, b1, w2, b2, *, tb=DEFAULT_TB):
    """Fused MLP forward.

    x  : (B, 20)   float32
    w1 : (20, 256) float32   (transposed vs. torch's (256, 20))
    b1 : (1, 256)  float32
    w2 : (256, 10) float32   (transposed vs. torch's (10, 256))
    b2 : (1, 10)   float32
    returns (B, 10) float32
    """
    B = x.shape[0]

    # Batch tile: multiple of 8, never larger than the (rounded-up) batch.
    tb = min(tb, _round_up(B, 8))
    B_pad = _round_up(B, tb)
    grid = (B_pad // tb,)

    # Pad batch so every grid step sees a full tile (padded rows sliced off).
    if B_pad != B:
        x = jnp.pad(x, ((0, B_pad - B), (0, 0)))

    # bf16 matmul operands (f32 accumulation inside the kernel).
    x_bf16 = x.astype(jnp.bfloat16)
    w1_bf16 = w1.astype(jnp.bfloat16)
    # Lane-dense second layer: pad N from 10 -> 128 with zeros.
    w2_bf16 = jnp.pad(w2, ((0, 0), (0, OUT_PAD - OUT_FEATURES))).astype(
        jnp.bfloat16)
    b2_pad = jnp.pad(b2, ((0, 0), (0, OUT_PAD - OUT_FEATURES)))

    cost = pl.CostEstimate(
        flops=2 * B_pad * (IN_FEATURES * HIDDEN + HIDDEN * OUT_PAD),
        transcendentals=0,
        bytes_accessed=(B_pad * IN_FEATURES * 2       # x (bf16)
                        + IN_FEATURES * HIDDEN * 2    # w1 (bf16)
                        + HIDDEN * 4                  # b1 (f32)
                        + HIDDEN * OUT_PAD * 2        # w2 (bf16)
                        + OUT_PAD * 4                 # b2 (f32)
                        + B_pad * OUT_PAD * 4))       # out (f32)

    out_padded = pl.pallas_call(
        mlp_kernel,
        out_shape=jax.ShapeDtypeStruct((B_pad, OUT_PAD), jnp.float32),
        grid=grid,
        in_specs=[
            # Activation stream: tiled along batch, auto double-buffered.
            pl.BlockSpec((tb, IN_FEATURES), lambda i: (i, 0)),
            # Weights/biases: full-size, VMEM-resident across grid steps.
            pl.BlockSpec((IN_FEATURES, HIDDEN), lambda i: (0, 0)),
            pl.BlockSpec((1, HIDDEN), lambda i: (0, 0)),
            pl.BlockSpec((HIDDEN, OUT_PAD), lambda i: (0, 0)),
            pl.BlockSpec((1, OUT_PAD), lambda i: (0, 0)),
        ],
        out_specs=pl.BlockSpec((tb, OUT_PAD), lambda i: (i, 0)),
        compiler_params=pltpu.CompilerParams(
            dimension_semantics=("parallel",)),
        cost_estimate=cost,
    )(x_bf16, w1_bf16, b1, w2_bf16, b2_pad)

    return out_padded[:B, :OUT_FEATURES]


def init_params(key):
    """nn.Linear-style init (uniform +/- 1/sqrt(fan_in)), weights as (in, out)."""
    k1, k2, k3, k4 = jax.random.split(key, 4)
    bound1 = 1.0 / jnp.sqrt(IN_FEATURES)
    w1 = jax.random.uniform(k1, (IN_FEATURES, HIDDEN), jnp.float32,
                            -bound1, bound1)
    b1 = jax.random.uniform(k2, (1, HIDDEN), jnp.float32, -bound1, bound1)
    bound2 = 1.0 / jnp.sqrt(HIDDEN)
    w2 = jax.random.uniform(k3, (HIDDEN, OUT_FEATURES), jnp.float32,
                            -bound2, bound2)
    b2 = jax.random.uniform(k4, (1, OUT_FEATURES), jnp.float32,
                            -bound2, bound2)
    return w1, b1, w2, b2


def mlp_reference(x, w1, b1, w2, b2):
    h = jnp.maximum(x @ w1 + b1, 0.0)
    return h @ w2 + b2


if __name__ == "__main__":
    key = jax.random.PRNGKey(0)
    k_x, k_p = jax.random.split(key)

    batch = 8
    x = jax.random.normal(k_x, (batch, IN_FEATURES), jnp.float32)
    w1, b1, w2, b2 = init_params(k_p)

    out = mlp_forward(x, w1, b1, w2, b2)
    out = jax.block_until_ready(out)

    ref = mlp_reference(x, w1, b1, w2, b2)
    assert out.shape == (batch, OUT_FEATURES)
    # bf16 matmul inputs with f32 accumulation -> relaxed tolerance vs f32 ref.
    assert jnp.allclose(out, ref, atol=5e-2, rtol=5e-2)

    print("KERNEL_OK")
</pallas_src>

<mosaic_0001>
module attributes {stable_mosaic.version = 11 : i64} {
  func.func @mlp_kernel(%arg0: i32, %arg1: memref<8x20xbf16, #tpu.memory_space<vmem>>, %arg2: memref<20x256xbf16, #tpu.memory_space<vmem>>, %arg3: memref<1x256xf32, #tpu.memory_space<vmem>>, %arg4: memref<256x128xbf16, #tpu.memory_space<vmem>>, %arg5: memref<1x128xf32, #tpu.memory_space<vmem>>, %arg6: memref<8x128xf32, #tpu.memory_space<vmem>>) attributes {dimension_semantics = [#tpu.dimension_semantics<parallel>], iteration_bounds = array<i64: 1>, scalar_prefetch = 0 : i64, scratch_operands = 0 : i64, tpu.core_type = #tpu.core_type<tc>, window_params = [{transform_indices = @transform_0, window_bounds = array<i64: 8, 20>}, {pipeline_mode = #tpu.pipeline_mode<synchronous>, transform_indices = @transform_1, window_bounds = array<i64: 20, 256>}, {pipeline_mode = #tpu.pipeline_mode<synchronous>, transform_indices = @transform_2, window_bounds = array<i64: 1, 256>}, {pipeline_mode = #tpu.pipeline_mode<synchronous>, transform_indices = @transform_3, window_bounds = array<i64: 256, 128>}, {pipeline_mode = #tpu.pipeline_mode<synchronous>, transform_indices = @transform_4, window_bounds = array<i64: 1, 128>}, {transform_indices = @transform_5, window_bounds = array<i64: 8, 128>}]} {
    %c0 = arith.constant 0 : index
    %c0_0 = arith.constant 0 : index
    %0 = vector.load %arg1[%c0, %c0_0] : memref<8x20xbf16, #tpu.memory_space<vmem>>, vector<8x20xbf16>
    %c0_1 = arith.constant 0 : index
    %c0_2 = arith.constant 0 : index
    %1 = vector.load %arg2[%c0_1, %c0_2] : memref<20x256xbf16, #tpu.memory_space<vmem>>, vector<20x256xbf16>
    %cst = arith.constant dense<0.000000e+00> : vector<8x256xf32>
    %2 = tpu.matmul %0, %1, %cst {dimension_numbers = #tpu.dot_dimension_numbers<[1], [0], [0], [1], [0, 0, 1, 1], [], []>} : vector<8x20xbf16>, vector<20x256xbf16>, vector<8x256xf32> -> vector<8x256xf32>
    %c0_3 = arith.constant 0 : index
    %c0_4 = arith.constant 0 : index
    %3 = vector.load %arg3[%c0_3, %c0_4] : memref<1x256xf32, #tpu.memory_space<vmem>>, vector<1x256xf32>
    %4 = vector.broadcast %3 : vector<1x256xf32> to vector<8x256xf32>
    %5 = arith.addf %2, %4 : vector<8x256xf32>
    %cst_5 = arith.constant 0.000000e+00 : f32
    %6 = vector.broadcast %cst_5 : f32 to vector<8x256xf32>
    %7 = arith.maximumf %5, %6 : vector<8x256xf32>
    %8 = arith.truncf %7 : vector<8x256xf32> to vector<8x256xbf16>
    %c0_6 = arith.constant 0 : index
    %c0_7 = arith.constant 0 : index
    %9 = vector.load %arg4[%c0_6, %c0_7] : memref<256x128xbf16, #tpu.memory_space<vmem>>, vector<256x128xbf16>
    %cst_8 = arith.constant dense<0.000000e+00> : vector<8x128xf32>
    %10 = tpu.matmul %8, %9, %cst_8 {dimension_numbers = #tpu.dot_dimension_numbers<[1], [0], [0], [1], [0, 0, 1, 1], [], []>} : vector<8x256xbf16>, vector<256x128xbf16>, vector<8x128xf32> -> vector<8x128xf32>
    %c0_9 = arith.constant 0 : index
    %c0_10 = arith.constant 0 : index
    %11 = vector.load %arg5[%c0_9, %c0_10] : memref<1x128xf32, #tpu.memory_space<vmem>>, vector<1x128xf32>
    %12 = vector.broadcast %11 : vector<1x128xf32> to vector<8x128xf32>
    %13 = arith.addf %10, %12 : vector<8x128xf32>
    %c0_11 = arith.constant 0 : index
    %c0_12 = arith.constant 0 : index
    %14 = vector.load %arg6[%c0_11, %c0_12] : memref<8x128xf32, #tpu.memory_space<vmem>>, vector<8x128xf32>
    tpu.vector_store %arg6[%c0_11, %c0_12], %13 {strides = array<i32>} : memref<8x128xf32, #tpu.memory_space<vmem>>, vector<8x128xf32>,
    return
  }
  func.func @transform_0(%arg0: i32) -> (i32, i32) {
    %c0_i32 = arith.constant 0 : i32
    %c0_i32_0 = arith.constant 0 : i32
    return %arg0, %c0_i32 : i32, i32
  }
  func.func @transform_1(%arg0: i32) -> (i32, i32) {
    %c0_i32 = arith.constant 0 : i32
    %c0_i32_0 = arith.constant 0 : i32
    %c0_i32_1 = arith.constant 0 : i32
    return %c0_i32, %c0_i32_0 : i32, i32
  }
  func.func @transform_2(%arg0: i32) -> (i32, i32) {
    %c0_i32 = arith.constant 0 : i32
    %c0_i32_0 = arith.constant 0 : i32
    %c0_i32_1 = arith.constant 0 : i32
    return %c0_i32, %c0_i32_0 : i32, i32
  }
  func.func @transform_3(%arg0: i32) -> (i32, i32) {
    %c0_i32 = arith.constant 0 : i32
    %c0_i32_0 = arith.constant 0 : i32
    %c0_i32_1 = arith.constant 0 : i32
    return %c0_i32, %c0_i32_0 : i32, i32
  }
  func.func @transform_4(%arg0: i32) -> (i32, i32) {
    %c0_i32 = arith.constant 0 : i32
    %c0_i32_0 = arith.constant 0 : i32
    %c0_i32_1 = arith.constant 0 : i32
    return %c0_i32, %c0_i32_0 : i32, i32
  }
  func.func @transform_5(%arg0: i32) -> (i32, i32) {
    %c0_i32 = arith.constant 0 : i32
    %c0_i32_0 = arith.constant 0 : i32
    return %arg0, %c0_i32 : i32, i32
  }
}

</mosaic_0001>

<bundles_post_ra>
// kernel: mlp_forward.1
= control target key start
LH: loop header
LB: loop body
LE: loop exit
PB: predicated region body
PF: predicated region fallthrough
CT: control target
= control target key end

     0   :  { %vm57_vm0 = vcmask 1041408   ;;  %v391_v3 = vmov 0   ;;  %vm53_vm1 = vcmask 162816   ;;  %s501_s0 = inlined_call_operand.vmem [shape: bf16[8,20], index: 0, kind: input, shape index: {}]   ;;  %s502_s1 = inlined_call_operand.vmem [shape: bf16[20,256], index: 1, kind: input, shape index: {}]   ;;  %s503_s2 = inlined_call_operand.vmem [shape: f32[1,256], index: 2, kind: input, shape index: {}]   ;;  %s504_s3 = inlined_call_operand.vmem [shape: bf16[256,128], index: 3, kind: input, shape index: {}]   ;;  %s505_s4 = inlined_call_operand.vmem [shape: f32[1,128], index: 4, kind: input, shape index: {}]   ;;  %s506_s5 = inlined_call_operand.hbm [shape: f32[8,128], index: 5, kind: output, shape index: {}]  }
   0x1   :  { %v346_v0 = vld [vmem:[%s502_s1 + $0x4] ss:$8 sps:$4 sm:$0xff]   ;;  %v348_v1 = vld [vmem:[%s502_s1] ss:$8 sps:$4 sm:$0xff]   ;;  %v25_v2 = vld [vmem:[%s502_s1 + $0x10] sm:$0x33]  ;;  %96 = vmatprep.mubr.bf16.mxu0 %v391_v3 }
   0x2   :  { %64 = vmatprep.subr.bf16.mxu0 %v346_v0  ;;  %v302_v4 = vcombine.high %v25_v2, %v25_v2  ;;  %v301_v5 = vcombine.low %v25_v2, %v25_v2  ;;  %v351_v6 = vld [vmem:[%s504_s3 + $0x40] sm:$0xff]   ;;  %v353_v9 = vld [vmem:[%s504_s3 + $0x48] sm:$0xff]   ;;  %v355_v12 = vld [vmem:[%s504_s3 + $0x50] sm:$0xff]  }
   0x3   :  { %65 = vmatpush1.bf16.msra.mxu0 %v348_v1  ;;  %v352_v7 = vld [vmem:[%s504_s3] sm:$0xff]   ;;  %322 = vmatprep.subr.bf16.mxu1 %v351_v6  ;;  %v354_v11 = vld [vmem:[%s504_s3 + $0x8] sm:$0xff]   ;;  %v356_v13 = vld [vmem:[%s504_s3 + $0x10] sm:$0xff]  }
   0x4   :  { %303 = vmatprep.subr.msk.bf16.mxu0 %vm57_vm0, %v302_v4  ;;  %v59_v8 = vsel %vm57_vm0, %v301_v5, 0  ;;  %v22_v10 = vld [vmem:[%s501_s0] sm:$0xf]  ;;  %323 = vmatpush3.bf16.msra.mxu1 %v352_v7  ;;  %v357_v14 = vld [vmem:[%s504_s3 + $0x58] sm:$0xff]  }
   0x5   :  { %324 = vmatprep.subr.bf16.mxu1 %v353_v9  ;;  %v358_v15 = vld [vmem:[%s504_s3 + $0x18] sm:$0xff]   ;;  %v359_v16 = vld [vmem:[%s504_s3 + $0x60] sm:$0xff]  }
   0x6   :  { %v360_v17 = vld [vmem:[%s504_s3 + $0x20] sm:$0xff]  }
   0x7   :  { %67 = vmatpush1.bf16.msra.mxu0 %v59_v8 }
   0x8   :  { %325 = vmatpush3.bf16.msra.mxu1 %v354_v11 }
   0x9   :  { %326 = vmatprep.subr.bf16.mxu1 %v355_v12 }
   0xa   :  { %304 = vmatmul.mubr.msk.bf16.vlgmr.msra.gmra.mrb[0].mxu0 %vm53_vm1, %v22_v10 }
   0xc   :  { %327 = vmatpush3.bf16.msra.mxu1 %v356_v13 }
   0xd   :  { %328 = vmatprep.subr.bf16.mxu1 %v357_v14 }
  0x10   :  { %329 = vmatpush3.bf16.msra.mxu1 %v358_v15 }
  0x11   :  { %10 = vsyncpa [#allocation3], 0  ;;  %330 = vmatprep.subr.bf16.mxu1 %v359_v16  ;;  %v361_v18 = vld [vmem:[%s504_s3 + $0x68] sm:$0xff]   ;;  %v363_v20 = vld [vmem:[%s504_s3 + $0x70] sm:$0xff]   ;;  %v28_v24 = vlaneseq }
  0x12   :  { %v362_v19 = vld [vmem:[%s504_s3 + $0x28] sm:$0xff]   ;;  %v364_v21 = vld [vmem:[%s504_s3 + $0x30] sm:$0xff]   ;;  %v365_v22 = vld [vmem:[%s504_s3 + $0x78] sm:$0xff]  }
  0x13   :  { %v366_v23 = vld [vmem:[%s504_s3 + $0x38] sm:$0xff]   ;;  %v29_v25 = vshrl.u32 %v28_v24, 7  ;;  %v26_v27 = vld [vmem:[%s503_s2] sm:$0x3]  ;;  %s392_s2 = smov [#allocation2]  }
  0x14   :  { %331 = vmatpush3.bf16.msra.mxu1 %v360_v17  ;;  %v305_v43 = vld [vmem:[%s505_s4] ss:$0 sm:$0xff]  ;;  %s291_s8 = sshll.u32 %s392_s2, 4  ;;  %s292_s8 = int_to_ptr.vmem [resolvable:$true] %s291_s8 }
  0x15   :  { %332 = vmatprep.subr.bf16.mxu1 %v361_v18  ;;  %v30_v26 = vsub.s32 0, %v29_v25  ;;  %v34_v28 = vsub.s32 1, %v29_v25  ;;  %s367_s9 = scalar_lea.vmem %s292_s8, 128  ;;  %p372_p1 = scmp.lt.s32.totalorder %s292_s8, %s292_s8 }
  0x16   :  { %p368_p0 = scmp.ne.s32.totalorder %s292_s8, %s367_s9  ;;  %p373_p2 = scmp.lt.s32.totalorder %s367_s9, %s367_s9 }
  0x17   :  { %v31_v29 = vrot.slane %v26_v27, %v30_v26  ;;  %v35_v30 = vrot.slane %v26_v27, %v34_v28 }
  0x18   :  { %333 = vmatpush3.bf16.msra.mxu1 %v362_v19  ;;  %p374_p3 = por %p373_p2, %p372_p1 }
  0x19   :  { %334 = vmatprep.subr.bf16.mxu1 %v363_v20 }
  0x1a   :  { %p375_p4 = pnand %p374_p3, %p368_p0 }
  0x1c   :  { %335 = vmatpush3.bf16.msra.mxu1 %v364_v21 }
  0x1d   :  { %336 = vmatprep.subr.bf16.mxu1 %v365_v22 }
  0x20   :  { %337 = vmatpush3.bf16.msra.mxu1 %v366_v23 }
  0xdd   :  { %v98_v31 = vpop.f32.mrb[0].mxu0 }
  0xde   :  { %v99_v32 = vadd.f32 %v98_v31, %v31_v29  ;;  %v100_v33 = vpop.f32.mrb[1].mxu0 }
  0xdf   :  { %v101_v34 = vadd.f32 %v100_v33, %v35_v30  ;;  %v102_v35 = vpop.f32.mrb[2].mxu0 }
  0xe0   :  { %v105_v36 = vmax.f32 %v99_v32, 0.0  ;;  %v103_v37 = vpop.f32.mrb[3].mxu0 }
  0xe1   :  { %v106_v38 = vmax.f32 %v101_v34, 0.0 }
  0xe2   :  { %v107_v40 = vpack.c.bf16 %v105_v36, %v105_v36 }
  0xe3   :  { %v108_v39 = vpack.c.bf16 %v106_v38, %v106_v38 }
  0xe5   :  { %276 = vmatprep.mubr.bf16.mxu1 %v108_v39 }
  0xe6   :  { %277 = vmatmul.mubr.bf16.vlgmr.msra.gmra.mrb[0].mxu1 %v107_v40 }
 0x1b9   :  { %v338_v41 = vpop.f32.mrb[0].mxu1 }
 0x1ba   :  { %v339_v42 = vpop.f32.mrb[1].mxu1 }
 0x1bb   :  { %v340_v44 = vadd.f32 %v339_v42, %v338_v41  ;;  %v341_v45 = vpop.f32.mrb[2].mxu1 }
 0x1bc   :  { %v342_v46 = vpop.f32.mrb[3].mxu1 }
 0x1bd   :  { %v279_v47 = vadd.f32 %v340_v44, %v305_v43 }
 0x1bf   :  { %284 = vst [vmem:[#allocation2] sm:$0xff] %v279_v47 }
 0x1c0   :  { %378 = shalt.err (!%p375_p4)
}
 0x1c1   :  { %s379_s0 = scalar_lea.hbm %s506_s5, 128 }
 0x1c2   :  { %p380_p5 = scmp.ne.s32.totalorder %s506_s5, %s379_s0  ;;  %p383_p6 = scmp.lt.u32.totalorder %s379_s0, %s506_s5 }
 0x1c4   :  { %p385_p7 = pnand %p383_p6, %p380_p5 }
 0x1c6   :  { %388 = shalt.err (!%p385_p7)
}
 0x1c7   :  { %294 = dma.vmem_to_hbm [thread:$0]  %s292_s8, 128, %s506_s5, [#allocation3]  }
 0x1c8   :  { %389 = dma.done.wait [#allocation3], 128  }
 0x1c9   :  { %390 = vsyncadd [#allocation3], 4294967168 }
 0x1ca   :  { %298 = vsyncpa [#allocation3], 1 }

</bundles_post_ra>
